<compile_context>
chip_gen: v7x
topology: tpu7x:2x2x1
jax: 0.10.0
libtpu: 0.0.40
codegen_flags: <defaults>
</compile_context>

<pallas_src>
from functools import partial

import jax
import jax.numpy as jnp
from jax import lax
from jax.experimental import pallas as pl
from jax.experimental.pallas import tpu as pltpu


# --------------------------------------------------------------------------
# Kernel
# --------------------------------------------------------------------------
def _chan_norm_kernel(x_ref, g_ref, b_ref, o_ref, *, eps):
    # x_ref block: (Bt, C, TN) — channel axis fully resident, spatial lane-dense.
    x = x_ref[...].astype(jnp.float32)                         # (Bt, C, TN)
    mean = jnp.mean(x, axis=1, keepdims=True)                  # (Bt, 1, TN)
    var = jnp.mean(jnp.square(x - mean), axis=1, keepdims=True)  # biased var
    inv = lax.rsqrt(var + eps)                                 # EUP rsqrt slot

    g = g_ref[...][None].astype(jnp.float32)                   # (1, C, 1)
    b = b_ref[...][None].astype(jnp.float32)                   # (1, C, 1)

    # Fold to per-position scale/shift: out = (x*inv - mean*inv) * g + b.
    # Only x (f32) plus small (Bt,1,TN) vectors stay live through the store.
    s = inv                                                    # (Bt, 1, TN)
    t = -(mean * inv)                                          # (Bt, 1, TN)
    o_ref[...] = ((x * s + t) * g + b).astype(o_ref.dtype)


# --------------------------------------------------------------------------
# Tile / VMEM sizing
# --------------------------------------------------------------------------
def _vmem_capacity_bytes():
    try:
        info = pltpu.get_tpu_info()
        for attr in ("vmem_capacity_bytes", "vmem_bytes", "vmem_capacity"):
            v = getattr(info, attr, None)
            if isinstance(v, int) and v > 0:
                return v
    except Exception:
        pass
    return 64 << 20  # conservative default (v7x per-TensorCore)


def _vmem_budget():
    """Returns (tile_budget_bytes, vmem_limit_cap_bytes) per generation."""
    cap = _vmem_capacity_bytes()
    if cap >= (128 << 20):          # v5e / v6e: 128 MiB physical VMEM
        return 72 << 20, 96 << 20
    return 40 << 20, 48 << 20       # v7x: 64 MiB per TensorCore


def _choose_tiles(B, C, N, itemsize, budget_bytes):
    """Pick (bt, tn, bytes_per_elem) with honest VMEM accounting.

    Per-tile VMEM ≈ input + output (each double-buffered at `itemsize`) plus
    ~2 full-tile f32 temporaries inside the kernel (f32 upcast and x - mean).
    """
    bytes_per_elem = 4 * itemsize + 8
    max_elems = max(budget_bytes // bytes_per_elem, C)

    # Spatial tile: prefer the full axis (one contiguous linear DMA per block);
    # only tile N when a single (1, C, N) block would blow the budget.
    if C * N <= max_elems or N < 128:
        tn = N
    else:
        tn = None
        for cand in range((N // 128) * 128, 127, -128):
            if N % cand == 0 and C * cand <= max_elems:
                tn = cand
                break
        if tn is None:
            tn = 128 if N % 128 == 0 else N  # last resort
    n_spatial = N // tn

    # Batch block: biggest divisor of B that fits the budget while keeping the
    # grid >= 2 (ideally >= 4) steps so both v7x TCs get work and the DMA
    # pipeline has something to overlap.
    total_at_bt1 = B * n_spatial
    target_steps = 4 if total_at_bt1 >= 4 else (2 if total_at_bt1 >= 2 else 1)
    bt = 1
    for d in range(1, B + 1):
        if B % d:
            continue
        if d * C * tn <= max_elems and (B // d) * n_spatial >= target_steps:
            bt = d
    return bt, tn, bytes_per_elem


# --------------------------------------------------------------------------
# Wrappers
# --------------------------------------------------------------------------
def _chan_norm_3d(xf, gp, bp, eps):
    """xf: (B, C, N) with the reduction over axis 1."""
    B, C, N = xf.shape
    itemsize = jnp.dtype(xf.dtype).itemsize
    budget, limit_cap = _vmem_budget()
    bt, tn, bytes_per_elem = _choose_tiles(B, C, N, itemsize, budget)

    tile_bytes = bytes_per_elem * bt * C * tn
    vmem_limit = int(min(limit_cap, max(tile_bytes + (8 << 20), 32 << 20)))

    cost = pl.CostEstimate(
        flops=7 * B * C * N,
        transcendentals=B * N,
        bytes_accessed=2 * B * C * N * itemsize + 2 * C * 4,
    )

    return pl.pallas_call(
        partial(_chan_norm_kernel, eps=float(eps)),
        out_shape=jax.ShapeDtypeStruct((B, C, N), xf.dtype),
        grid=(B // bt, N // tn),
        in_specs=[
            pl.BlockSpec((bt, C, tn), lambda bi, ni: (bi, 0, ni)),  # x tile
            pl.BlockSpec((C, 1), lambda bi, ni: (0, 0)),            # g
            pl.BlockSpec((C, 1), lambda bi, ni: (0, 0)),            # b
        ],
        out_specs=pl.BlockSpec((bt, C, tn), lambda bi, ni: (bi, 0, ni)),
        compiler_params=pltpu.CompilerParams(
            dimension_semantics=("parallel", "parallel"),
            vmem_limit_bytes=vmem_limit,
        ),
        cost_estimate=cost,
    )(xf, gp, bp)


def pre_norm(x, g, b, fn=lambda t: t, eps=1e-5):
    """x: (B, C, H, W) NCHW; g, b: (1, C, 1, 1). Returns fn(ChanNorm(x))."""
    B, C, H, W = x.shape
    N = H * W
    gp = g.reshape(C, 1).astype(jnp.float32)
    bp = b.reshape(C, 1).astype(jnp.float32)

    if N >= 128:
        # Zero-copy NCHW -> (B, C, HW): lane-dense, contiguous per-block DMA.
        y = _chan_norm_3d(x.reshape(B, C, N), gp, bp, eps).reshape(B, C, H, W)
    else:
        # Deep GAN layers (4x4 / 8x8 maps): fold batch into the lane axis
        # (channel-major) so loads/stores stay lane-dense instead of masked.
        xcm = jnp.transpose(x, (1, 0, 2, 3)).reshape(1, C, B * N)
        ycm = _chan_norm_3d(xcm, gp, bp, eps)
        y = jnp.transpose(ycm.reshape(C, B, H, W), (1, 0, 2, 3))

    # TODO(synk): PreNorm's `fn` is an arbitrary wrapped module; it is applied
    # here as a user-supplied JAX callable outside the kernel.
    return fn(y)


def pre_norm_ref(x, g, b, fn=lambda t: t, eps=1e-5):
    """Pure-JAX reference mirroring PyTorch PreNorm/ChanNorm forward."""
    mean = jnp.mean(x, axis=1, keepdims=True)
    var = jnp.mean((x - mean) ** 2, axis=1, keepdims=True)  # unbiased=False
    y = (x - mean) / jnp.sqrt(var + eps) * g + b
    return fn(y)


# --------------------------------------------------------------------------
# Demo / self-check
# --------------------------------------------------------------------------
if __name__ == "__main__":
    key = jax.random.PRNGKey(0)
    k0, k1, k2, k3, k4, k5 = jax.random.split(key, 6)
    fn = lambda t: t  # identity wrapped fn for the demo

    # Main path: N = H*W >= 128 (lane-dense spatial axis, contiguous DMA).
    B, C, H, W = 2, 4, 16, 16
    x = jax.random.normal(k0, (B, C, H, W), jnp.float32)
    g = 1.0 + 0.1 * jax.random.normal(k1, (1, C, 1, 1), jnp.float32)
    b = 0.1 * jax.random.normal(k2, (1, C, 1, 1), jnp.float32)

    out = jax.block_until_ready(pre_norm(x, g, b, fn=fn))
    ref = pre_norm_ref(x, g, b, fn=fn)
    assert out.shape == (B, C, H, W)
    assert jnp.allclose(out, ref, atol=1e-5, rtol=1e-5), "mismatch (main path)"

    # Small-feature-map path: N < 128 -> channel-major lane packing.
    xs = jax.random.normal(k3, (2, 8, 4, 4), jnp.float32)
    gs = 1.0 + 0.1 * jax.random.normal(k4, (1, 8, 1, 1), jnp.float32)
    bs = 0.1 * jax.random.normal(k5, (1, 8, 1, 1), jnp.float32)
    outs = jax.block_until_ready(pre_norm(xs, gs, bs, fn=fn))
    refs = pre_norm_ref(xs, gs, bs, fn=fn)
    assert jnp.allclose(outs, refs, atol=1e-5, rtol=1e-5), "mismatch (small-N path)"

    print("KERNEL_OK")
</pallas_src>

<mosaic_0001>
module attributes {stable_mosaic.version = 11 : i64} {
  func.func @_chan_norm_kernel(%arg0: i32, %arg1: i32, %arg2: memref<1x4x256xf32, #tpu.memory_space<vmem>>, %arg3: memref<4x1xf32, #tpu.memory_space<vmem>>, %arg4: memref<4x1xf32, #tpu.memory_space<vmem>>, %arg5: memref<1x4x256xf32, #tpu.memory_space<vmem>>) attributes {dimension_semantics = [#tpu.dimension_semantics<parallel>, #tpu.dimension_semantics<parallel>], iteration_bounds = array<i64: 2, 1>, scalar_prefetch = 0 : i64, scratch_operands = 0 : i64, tpu.core_type = #tpu.core_type<tc>, window_params = [{transform_indices = @transform_0, window_bounds = array<i64: 1, 4, 256>}, {pipeline_mode = #tpu.pipeline_mode<synchronous>, transform_indices = @transform_1, window_bounds = array<i64: 4, 1>}, {pipeline_mode = #tpu.pipeline_mode<synchronous>, transform_indices = @transform_2, window_bounds = array<i64: 4, 1>}, {transform_indices = @transform_3, window_bounds = array<i64: 1, 4, 256>}]} {
    %c0 = arith.constant 0 : index
    %c0_0 = arith.constant 0 : index
    %c0_1 = arith.constant 0 : index
    %0 = vector.load %arg2[%c0, %c0_0, %c0_1] : memref<1x4x256xf32, #tpu.memory_space<vmem>>, vector<1x4x256xf32>
    %cst = arith.constant dense<0.000000e+00> : vector<1x256xf32>
    %1 = vector.multi_reduction <add>, %0, %cst [1] : vector<1x4x256xf32> to vector<1x256xf32>
    %2 = vector.shape_cast %1 : vector<1x256xf32> to vector<1x1x256xf32>
    %cst_2 = arith.constant 4.000000e+00 : f32
    %3 = vector.broadcast %cst_2 : f32 to vector<1x1x256xf32>
    %4 = arith.divf %2, %3 : vector<1x1x256xf32>
    %5 = vector.broadcast %4 : vector<1x1x256xf32> to vector<1x4x256xf32>
    %6 = arith.subf %0, %5 : vector<1x4x256xf32>
    %7 = arith.mulf %6, %6 : vector<1x4x256xf32>
    %cst_3 = arith.constant dense<0.000000e+00> : vector<1x256xf32>
    %8 = vector.multi_reduction <add>, %7, %cst_3 [1] : vector<1x4x256xf32> to vector<1x256xf32>
    %9 = vector.shape_cast %8 : vector<1x256xf32> to vector<1x1x256xf32>
    %cst_4 = arith.constant 4.000000e+00 : f32
    %10 = vector.broadcast %cst_4 : f32 to vector<1x1x256xf32>
    %11 = arith.divf %9, %10 : vector<1x1x256xf32>
    %cst_5 = arith.constant 9.99999974E-6 : f32
    %12 = vector.broadcast %cst_5 : f32 to vector<1x1x256xf32>
    %13 = arith.addf %11, %12 : vector<1x1x256xf32>
    %14 = math.rsqrt %13 : vector<1x1x256xf32>
    %c0_6 = arith.constant 0 : index
    %c0_7 = arith.constant 0 : index
    %15 = vector.load %arg3[%c0_6, %c0_7] : memref<4x1xf32, #tpu.memory_space<vmem>>, vector<4x1xf32>
    %16 = vector.shape_cast %15 : vector<4x1xf32> to vector<1x4x1xf32>
    %c0_8 = arith.constant 0 : index
    %c0_9 = arith.constant 0 : index
    %17 = vector.load %arg4[%c0_8, %c0_9] : memref<4x1xf32, #tpu.memory_space<vmem>>, vector<4x1xf32>
    %18 = vector.shape_cast %17 : vector<4x1xf32> to vector<1x4x1xf32>
    %19 = arith.mulf %4, %14 : vector<1x1x256xf32>
    %cst_10 = arith.constant 0.000000e+00 : f32
    %20 = vector.broadcast %cst_10 : f32 to vector<1x1x256xf32>
    %21 = arith.subf %20, %19 : vector<1x1x256xf32>
    %22 = vector.broadcast %14 : vector<1x1x256xf32> to vector<1x4x256xf32>
    %23 = arith.mulf %0, %22 : vector<1x4x256xf32>
    %24 = vector.broadcast %21 : vector<1x1x256xf32> to vector<1x4x256xf32>
    %25 = arith.addf %23, %24 : vector<1x4x256xf32>
    %26 = vector.broadcast %16 : vector<1x4x1xf32> to vector<1x4x256xf32>
    %27 = arith.mulf %25, %26 : vector<1x4x256xf32>
    %28 = vector.broadcast %18 : vector<1x4x1xf32> to vector<1x4x256xf32>
    %29 = arith.addf %27, %28 : vector<1x4x256xf32>
    %c0_11 = arith.constant 0 : index
    %c0_12 = arith.constant 0 : index
    %c0_13 = arith.constant 0 : index
    %30 = vector.load %arg5[%c0_11, %c0_12, %c0_13] : memref<1x4x256xf32, #tpu.memory_space<vmem>>, vector<1x4x256xf32>
    tpu.vector_store %arg5[%c0_11, %c0_12, %c0_13], %29 {strides = array<i32>} : memref<1x4x256xf32, #tpu.memory_space<vmem>>, vector<1x4x256xf32>,
    return
  }
  func.func @transform_0(%arg0: i32, %arg1: i32) -> (i32, i32, i32) {
    %c0_i32 = arith.constant 0 : i32
    %c0_i32_0 = arith.constant 0 : i32
    return %arg0, %c0_i32, %arg1 : i32, i32, i32
  }
  func.func @transform_1(%arg0: i32, %arg1: i32) -> (i32, i32) {
    %c0_i32 = arith.constant 0 : i32
    %c0_i32_0 = arith.constant 0 : i32
    %c0_i32_1 = arith.constant 0 : i32
    return %c0_i32, %c0_i32_0 : i32, i32
  }
  func.func @transform_2(%arg0: i32, %arg1: i32) -> (i32, i32) {
    %c0_i32 = arith.constant 0 : i32
    %c0_i32_0 = arith.constant 0 : i32
    %c0_i32_1 = arith.constant 0 : i32
    return %c0_i32, %c0_i32_0 : i32, i32
  }
  func.func @transform_3(%arg0: i32, %arg1: i32) -> (i32, i32, i32) {
    %c0_i32 = arith.constant 0 : i32
    %c0_i32_0 = arith.constant 0 : i32
    return %arg0, %c0_i32, %arg1 : i32, i32, i32
  }
}

</mosaic_0001>

<bundles_post_ra>
// kernel: tpu_custom_call.1
= control target key start
LH: loop header
LB: loop body
LE: loop exit
PB: predicated region body
PF: predicated region fallthrough
CT: control target
= control target key end

     0   :  { %8 = vsyncpa [#allocation3], 0  ;;  %s813_s0 = inlined_call_operand.hbm [shape: f32[2,4,256], index: 0, kind: input, shape index: {}]   ;;  %s814_s1 = inlined_call_operand.vmem [shape: f32[4,1], index: 1, kind: input, shape index: {}]   ;;  %s815_s2 = inlined_call_operand.vmem [shape: f32[4,1], index: 2, kind: input, shape index: {}]   ;;  %s816_s3 = inlined_call_operand.hbm [shape: f32[2,4,256], index: 3, kind: output, shape index: {}]  }
   0x1   :  { %10 = vsyncpa [#allocation3 + $0x1], 0 }
   0x2   :  { %11 = vsyncpa [#allocation4], 0 }
   0x3   :  { %13 = vsyncpa [#allocation4 + $0x1], 0  ;;  %s627_s12 = smov 0   ;;  %s629_s13 = smov 0  }
   0x4   :  { %s631_s14 = smov 0   ;;  %s633_s15 = smov 0  }
   0x5   :  { %s635_s16 = smov 0   ;;  %s637_s17 = smov 0  }
   0x6 LB: > { %s402_s18 = sadd.s32 4294967295, %s601_s17   ;;  %s403_s19 = sadd.s32 4294967294, %s601_s17   ;;  %s601_s17 = sphi %s637_s17, %s19_s17   ;;  %s597_s16 = sphi %s635_s16, %s832_s16   ;;  %s593_s15 = sphi %s633_s15, %s831_s15   ;;  %s589_s14 = sphi %s631_s14, %s830_s14   ;;  %s585_s13 = sphi %s629_s13, %s829_s13   ;;  %s581_s12 = sphi %s627_s12, %s828_s12  }
   0x7   : > { %s31_s20 = sadd.s32 1, %s597_s16  ;;  %s40_s21 = sadd.s32 1, %s589_s14 }
   0x8   : > { %p33_p0 = scmp.ge.s32.totalorder %s31_s20, 2  ;;  %p47_p1 = scmp.ne.s32.totalorder %s589_s14, %s585_s13 }
   0x9   : > { %p48_p2 = scmp.eq.s32.totalorder %s601_s17, 0  ;;  %p53_p3 = scmp.ne.s32.totalorder %s585_s13, %s581_s12 }
   0xa   : > { %s834_s20 = smov (%p33_p0, %s31_s20), 0  ;;  %p54_p5 = scmp.eq.s32.totalorder %s402_s18, 0 }
   0xb   : > { %p668_p4 = por %p48_p2, %p47_p1  ;;  %s35_s23 = ssub.s32 %s597_s16, %s834_s20 }
   0xc   : > { %p121_p6 = scmp.eq.s32.totalorder %s402_s18, 1  ;;  %p38_p7 = scmp.eq.s32.totalorder %s35_s23, 0 }
   0xd   : > { %p674_p8 = por %p54_p5, %p53_p3  ;;  %p127_p10 = scmp.eq.s32.totalorder %s403_s19, 1 }
   0xe   : > { %p678_p9 = por %p121_p6, %p47_p1  ;;  %p431_p13 = scmp.lt.s32.totalorder %s601_s17, 2 }
   0xf   : > { %s683_s26 = scalar_select %p38_p7, %s589_s14, %s40_s21  }
  0x10   : > { %s820_s25 = scalar_select %p678_p9, 1, 0 }
  0x11   : > { %p685_p11 = por %p127_p10, %p53_p3  ;;  %s153_s28 = sand.u32 1, %s589_s14  }
  0x12   : > { %s406_s29 = sshll.u32 %s153_s28, 3  ;;  %s417_s30 = sshll.u32 %s597_s16, 7 }
  0x13   : > { %s821_s27 = scalar_select %p685_p11, 1, 0 }
  0x14   : > { %s696_s6 = scalar_lea.hbm %s813_s0, %s417_s30  ;;  %s157_s7 = scalar_lea.vmem [#allocation2], %s406_s29 }
  0x15   : > { %s167_s8 = sshll.u32 %s157_s7, 4  ;;  %p702_p0 = pnand %p431_p13, %p668_p4  ;;  %s698_s8 = int_to_ptr.vmem [resolvable:$true] %s167_s8 }
  0x16   : > { %s154_s10 = scalar_lea.sflag [#allocation3], %s153_s28  ;;  %s489_s11 = scalar_lea.hbm %s696_s6, 128 }
  0x17   : > { %p490_p3 = scmp.ne.s32.totalorder %s696_s6, %s489_s11  ;;  %p491_p5 = pneg %p702_p0 }
  0x18   : > { %s494_s21 = scalar_lea.hbm %s813_s0, 256  ;;  %p495_p4 = scmp.lt.u32.totalorder %s696_s6, %s813_s0 }
  0x19   : > { %p492_p6 = pnand %p491_p5, %p490_p3  ;;  %p496_p10 = scmp.lt.u32.totalorder %s494_s21, %s489_s11 }
  0x1a   : > { %p498_p12 = scmp.lt.u32.totalorder %s489_s11, %s696_s6 }
  0x1b   : > { %p493_p7 = pneg %p492_p6  ;;  %p497_p13 = por %p496_p10, %p495_p4 }
  0x1d   : > { %p499_p1 = por %p498_p12, %p497_p13 }
  0x1f   : > { %p500_p2 = pnand %p499_p1, %p493_p7 }
  0x21   : > { %503 = shalt.err (!%p500_p2)
}
  0x22   : > { %s504_s28 = scalar_lea.vmem %s698_s8, 128  ;;  %s603_s29 = smov [#allocation2]  }
  0x23   : > { %p505_p3 = scmp.ne.s32.totalorder %s698_s8, %s504_s28  ;;  %s509_s30 = sshll.u32 %s603_s29, 4  ;;  %s510_s30 = int_to_ptr.vmem [resolvable:$false] %s509_s30 }
  0x24   : > { %s511_s4 = scalar_lea.vmem %s510_s30, 256  ;;  %p512_p9 = scmp.lt.s32.totalorder %s698_s8, %s510_s30 }
  0x25   : > { %p507_p6 = pnand %p505_p3, %p491_p5  ;;  %p513_p4 = scmp.lt.s32.totalorder %s511_s4, %s504_s28 }
  0x27   : > { %p508_p11 = pneg %p507_p6  ;;  %p514_p10 = por %p513_p4, %p512_p9 }
  0x29   : > { %p515_p12 = pnand %p514_p10, %p508_p11 }
  0x2b   : > { %518 = shalt.err (!%p515_p12)
}
  0x2c   : > { %426 = dma.hbm_to_vmem [thread:$0]  (!%p702_p0), %s696_s6, 128, %s698_s8, %s154_s10  }
  0x2d   : > { %p823_p1 = scmp.lt.s32.totalorder %s601_s17, 3  ;;  %p824_p2 = scmp.ge.s32.totalorder %s601_s17, 1 }
  0x2f   : > { %p173_p5 = pnand %p824_p2, %p823_p1 }
  0x30   : > { %s738_s5 = sand.u32 (!%p173_p5), 1, %s585_s13  }
  0x31   : > { %176 = sbr.rel (%p173_p5) target bundleno = 209 (0xd1), region = 32  ;;  %s410_s7 = sshll.u32 (!%p173_p5), %s738_s5, 3 }
  0x32   : > { %s179_s11 = scalar_lea.sflag (!%p173_p5), [#allocation3], %s738_s5  ;;  %s182_s9 = scalar_lea.vmem (!%p173_p5), [#allocation2], %s410_s7 }
  0x38   : > { %572 = dma.done.wait (%p674_p8), %s179_s11, 128  }
  0x39   : > { %574 = vsyncadd (%p674_p8), %s179_s11, 4294967168  ;;  %v604_v0 = vmov 0   ;;  %v258_v1 = vld [vmem:[%s814_s1] sm:$0xf]  ;;  %vm211_vm0 = vcmask 1043456   ;;  %v281_v45 = vlaneseq  ;;  %s418_s24 = sshll.u32 %s593_s15, 7 }
  0x3a   : > { %483 = vset.pattern.permute.xlu0 %v604_v0  ;;  %v259_v2 = vld [vmem:[%s815_s2] sm:$0xf]  ;;  %v605_v46 = vmov 839922192   ;;  %s204_s19 = scalar_lea.vmem [#allocation5], %s410_s7  ;;  %s764_s28 = scalar_lea.hbm %s816_s3, %s418_s24 }
  0x3b   : > { %276 = vperm.xlu0 %483, %v258_v1   ;;  %v207_v3 = vld [vmem:[%s182_s9] sm:$0xff]  ;;  %v279_v47 = vunpack.c.l.s4 %v605_v46  ;;  %v282_v50 = vshrl.u32 %v281_v45, 7  ;;  %s318_s21 = sshll.u32 %s204_s19, 4  ;;  %s302_s29 = scalar_lea.sflag [#allocation4], %s738_s5  ;;  %s766_s21 = int_to_ptr.vmem [resolvable:$true] %s318_s21 }
  0x3c   : > { %v209_v4 = vcombine.high %v207_v3, %v207_v3  ;;  %v212_v5 = vsel %vm211_vm0, %v207_v3, 0.0  ;;  %s519_s30 = scalar_lea.vmem %s766_s21, 128  ;;  %p825_p9 = scmp.ne.s32.totalorder %s820_s25, 0 }
  0x3d   : > { %v213_v7 = vrot.slane %v212_v5, 4  ;;  %v280_v51 = vunpack.c.0.s8 %v279_v47  ;;  %p520_p8 = scmp.ne.s32.totalorder %s766_s21, %s519_s30  ;;  %s606_s15 = smov [#allocation5]  }
  0x3e   : > { %v219_v6 = vsel %vm211_vm0, %v209_v4, 0.0  ;;  %s523_s4 = sshll.u32 %s606_s15, 4  ;;  %s524_s4 = int_to_ptr.vmem [resolvable:$false] %s523_s4 }
  0x3f   : > { %289 = vperm.xlu0 %483, %v259_v2   ;;  %v220_v8 = vrot.slane %v219_v6, 4  ;;  %v214_v9 = vadd.f32 %v213_v7, %v212_v5  ;;  %v283_v55 = vsub.s32 %v280_v51, %v282_v50  ;;  %p521_p11 = pnand %p520_p8, %p825_p9  ;;  %s525_s7 = scalar_lea.vmem %s524_s4, 256 }
  0x40   : > { %p526_p7 = scmp.lt.s32.totalorder %s766_s21, %s524_s4  ;;  %p527_p13 = scmp.lt.s32.totalorder %s525_s7, %s519_s30 }
  0x41   : > { %v221_v10 = vadd.f32 %v220_v8, %v219_v6  ;;  %v215_v11 = vrot.slane %v214_v9, 2  ;;  %p522_p0 = pneg %p521_p11 }
  0x42   : > { %p528_p3 = por %p527_p13, %p526_p7 }
  0x43   : > { %v222_v12 = vrot.slane %v221_v10, 2  ;;  %v216_v13 = vadd.f32 %v215_v11, %v214_v9 }
  0x44   : > { %p529_p6 = pnand %p528_p3, %p522_p0 }
  0x45   : > { %v223_v14 = vadd.f32 %v222_v12, %v221_v10  ;;  %v217_v15 = vrot.slane %v216_v13, 1 }
  0x47   : > { %v224_v16 = vrot.slane %v223_v14, 1  ;;  %v218_v17 = vadd.f32 %v217_v15, %v216_v13 }
  0x49   : > { %v225_v18 = vadd.f32 %v224_v16, %v223_v14  ;;  %v227_v19 = vmul.f32 0.25, %v218_v17 }
  0x4b   : > { %v228_v20 = vmul.f32 0.25, %v225_v18 }
  0x4d   : > { %v231_v21 = vcombine.low %v227_v19, %v228_v20 }
  0x4f   : > { %v233_v22 = vsub.f32 %v207_v3, %v231_v21 }
  0x51   : > { %v234_v23 = vmul.f32 %v233_v22, %v233_v22 }
  0x53   : > { %v236_v24 = vcombine.high %v234_v23, %v234_v23  ;;  %v238_v25 = vsel %vm211_vm0, %v234_v23, 0.0 }
  0x54   : > { %v239_v27 = vrot.slane %v238_v25, 4 }
  0x55   : > { %v245_v26 = vsel %vm211_vm0, %v236_v24, 0.0 }
  0x56   : > { %v246_v28 = vrot.slane %v245_v26, 4  ;;  %v240_v29 = vadd.f32 %v239_v27, %v238_v25 }
  0x58   : > { %v247_v30 = vadd.f32 %v246_v28, %v245_v26  ;;  %v241_v31 = vrot.slane %v240_v29, 2 }
  0x5a   : > { %v248_v32 = vrot.slane %v247_v30, 2  ;;  %v242_v33 = vadd.f32 %v241_v31, %v240_v29 }
  0x5c   : > { %v249_v34 = vadd.f32 %v248_v32, %v247_v30  ;;  %v243_v35 = vrot.slane %v242_v33, 1 }
  0x5e   : > { %v250_v36 = vrot.slane %v249_v34, 1  ;;  %v244_v37 = vadd.f32 %v243_v35, %v242_v33 }
  0x60   : > { %v251_v38 = vadd.f32 %v250_v36, %v249_v34  ;;  %v252_v39 = vmul.f32 0.25, %v244_v37 }
  0x62   : > { %v253_v40 = vmul.f32 0.25, %v251_v38  ;;  %v254_v41 = vadd.f32 1e-05, %v252_v39 }
  0x64   : > { %v255_v42 = vadd.f32 1e-05, %v253_v40  ;;  %485 = vrsqrt.f32 %v254_v41 }
  0x66   : > { %487 = vrsqrt.f32 %v255_v42 }
  0x6e   : > { %v486_v43 = vpop.eup %485 }
  0x6f   : > { %v260_v48 = vmul.f32 %v486_v43, %v227_v19 }
  0x70   : > { %v488_v44 = vpop.eup %487 }
  0x71   : > { %v261_v49 = vmul.f32 %v488_v44, %v228_v20  ;;  %v262_v52 = vsub.f32 0.0, %v260_v48  ;;  %v266_v54 = vcombine.low %v486_v43, %v488_v44 }
  0x73   : > { %v263_v53 = vsub.f32 0.0, %v261_v49  ;;  %v268_v56 = vmul.f32 %v266_v54, %v207_v3 }
  0x75   : > { %v271_v57 = vcombine.low %v262_v52, %v263_v53 }
  0x77   : > { %v273_v59 = vadd.f32 %v271_v57, %v268_v56 }
  0xba   : > { %v277_v58 = vpop.permute.xlu0 %276 }
  0xbb   : > { %v284_v60 = vrot.slane %v277_v58, %v283_v55 }
  0xbd   : > { %v286_v62 = vmul.f32 %v284_v60, %v273_v59 }
  0xbe   : > { %v290_v61 = vpop.permute.xlu0 %289 }
  0xbf   : > { %v297_v63 = vrot.slane %v290_v61, %v283_v55 }
  0xc1   : > { %v299_v0 = vadd.f32 %v297_v63, %v286_v62 }
  0xc3   : > { %300 = vst [vmem:[%s204_s19] sm:$0xff] %v299_v0 }
  0xc4   : > { %532 = shalt.err (!%p529_p6)
}
  0xc5   : > { %s533_s5 = scalar_lea.hbm %s764_s28, 128  ;;  %s537_s6 = scalar_lea.hbm %s816_s3, 256 }
  0xc6   : > { %p534_p4 = scmp.ne.s32.totalorder %s764_s28, %s533_s5  ;;  %p538_p1 = scmp.lt.u32.totalorder %s764_s28, %s816_s3 }
  0xc7   : > { %p539_p2 = scmp.lt.u32.totalorder %s537_s6, %s533_s5  ;;  %p541_p8 = scmp.lt.u32.totalorder %s533_s5, %s764_s28 }
  0xc8   : > { %p535_p10 = pnand %p534_p4, %p825_p9 }
  0xc9   : > { %p540_p5 = por %p539_p2, %p538_p1 }
  0xca   : > { %p536_p12 = pneg %p535_p10 }
  0xcb   : > { %p542_p11 = por %p541_p8, %p540_p5 }
  0xcd   : > { %p543_p0 = pnand %p542_p11, %p536_p12 }
  0xcf   : > { %546 = shalt.err (!%p543_p0)
}
  0xd0   : > { %421 = dma.vmem_to_hbm [thread:$0]  (%p825_p9), %s766_s21, 128, %s764_s28, %s302_s29  }
  0xd1 PF: > { %s330_s18 = sand.u32 1, %s581_s12   ;;  %p826_p7 = scmp.ne.s32.totalorder %s821_s27, 0 }
  0xd2   : > { %p827_p13 = scmp.ge.s32.totalorder %s601_s17, 2  ;;  %s331_s24 = scalar_lea.sflag [#allocation4], %s330_s18 }
  0xd4   : > { %p428_p3 = pnand %p827_p13, %p826_p7 }
  0xd6   : > { %576 = dma.done.wait (!%p428_p3), %s331_s24, 128  }
  0xd7   : > { %578 = vsyncadd (!%p428_p3), %s331_s24, 4294967168  ;;  %s19_s17 = sadd.s32 1, %s601_s17   ;;  %s828_s12 = smov %s585_s13 }
  0xd8   : > { %p16_p6 = scmp.ge.s32.totalorder %s19_s17, 4   ;;  %s829_s13 = smov %s589_s14 }
  0xd9   : > { %s830_s14 = smov %s683_s26  ;;  %s831_s15 = smov %s597_s16 }
  0xda   : > { %s832_s16 = smov %s834_s20  ;;  %18 = sbr.rel (!%p16_p6) target bundleno = 6 (0x6), region = 77 }
  0xe1   :  { %336 = vsyncpa [#allocation3], 1 }
  0xe2   :  { %338 = vsyncpa [#allocation3 + $0x1], 1 }
  0xe3   :  { %339 = vsyncpa [#allocation4], 1 }
  0xe4   :  { %341 = vsyncpa [#allocation4 + $0x1], 1 }

</bundles_post_ra>
